<compile_context>
chip_gen: v5e
topology: v5e:2x2
jax: 0.10.0
libtpu: 0.0.40
codegen_flags: <defaults>
</compile_context>

<pallas_src>
import jax
import jax.numpy as jnp
from jax.experimental import pallas as pl
from jax.experimental.pallas import tpu as pltpu


def _round_up(x, m):
    return ((x + m - 1) // m) * m


def instance_norm_fc_kernel(params_ref, x_ref, o_ref):
    # params_ref (SMEM): [weight, bias, eps]
    # x_ref / o_ref:     (TB, F) block of rows; F is the full feature axis (lanes)
    w = params_ref[0]
    b = params_ref[1]
    eps = params_ref[2]

    x = x_ref[...].astype(jnp.float32)            # reductions in f32 (v5e-safe)
    inv_f = jnp.float32(1.0 / x.shape[-1])

    # One-pass moments: both XLU reductions off a single read of x.
    s1 = jnp.sum(x, axis=-1, keepdims=True)
    s2 = jnp.sum(x * x, axis=-1, keepdims=True)
    mean = s1 * inv_f
    var = jnp.maximum(s2 * inv_f - mean * mean, 0.0)   # biased var, clamp cancellation
    inv_std = jax.lax.rsqrt(var + eps)                 # EUP

    # Fold normalize + affine into one mul-add per element:
    #   out = (x - mean) * inv_std * w + b  ==  x * scale + shift
    scale = inv_std * w
    shift = b - mean * scale
    o_ref[...] = (x * scale + shift).astype(o_ref.dtype)


def instance_norm_fc_forward(x, weight, bias, eps=1e-5, max_block_rows=4096):
    """InstanceNormFC.forward(x) for x of shape (N, F)."""
    N, F = x.shape
    out_dtype = x.dtype
    in_bytes = jnp.dtype(x.dtype).itemsize
    out_bytes = jnp.dtype(out_dtype).itemsize

    # ---- per-generation VMEM sizing -------------------------------------
    vmem_phys = 64 << 20                     # conservative default (v7x: 64 MiB)
    try:
        info = pltpu.get_tpu_info()
        vmem_phys = int(getattr(info, "vmem_capacity_bytes", vmem_phys))
    except Exception:
        pass
    # Scoped VMEM limit: well under physical (headroom for internal scratch).
    vmem_limit = min(vmem_phys * 3 // 4, 100 << 20)

    # Double-buffered input block + double-buffered output block must fit.
    bytes_per_row = 2 * F * (in_bytes + out_bytes)
    tb = (int(vmem_limit * 0.8) // max(bytes_per_row, 1)) // 8 * 8
    tb = max(8, min(tb, _round_up(max_block_rows, 8), _round_up(max(N, 1), 8)))

    # Keep >= 2 grid steps (v7x megacore shards the parallel axis) when there
    # is enough work to split.
    if N > 8 and pl.cdiv(N, tb) < 2:
        tb = _round_up(pl.cdiv(N, 2), 8)

    params = jnp.array([weight, bias, eps], jnp.float32)

    return pl.pallas_call(
        instance_norm_fc_kernel,
        out_shape=jax.ShapeDtypeStruct((N, F), out_dtype),
        grid=(pl.cdiv(N, tb),),                       # ragged last block is masked
        in_specs=[
            pl.BlockSpec(memory_space=pltpu.MemorySpace.SMEM),   # weight/bias/eps
            pl.BlockSpec((tb, F), lambda i: (i, 0)),             # rows, F lane-dense
        ],
        out_specs=pl.BlockSpec((tb, F), lambda i: (i, 0)),
        compiler_params=pltpu.CompilerParams(
            dimension_semantics=("parallel",),
            vmem_limit_bytes=vmem_limit),
    )(params, x)


# ---------------- pure-JAX reference (PyTorch InstanceNorm1d semantics) -------
def instance_norm_fc_reference(x, weight, bias, eps=1e-5):
    x32 = x.astype(jnp.float32)
    mean = jnp.mean(x32, axis=-1, keepdims=True)
    var = jnp.mean((x32 - mean) ** 2, axis=-1, keepdims=True)   # biased variance
    out = (x32 - mean) / jnp.sqrt(var + eps) * jnp.float32(weight) + jnp.float32(bias)
    return out.astype(x.dtype)


if __name__ == "__main__":
    key = jax.random.PRNGKey(0)

    # Affine params of nn.InstanceNorm1d(1, affine=True) are shape-(1,) scalars
    # (init: weight=1, bias=0).  Use nonzero values so the affine path is
    # exercised; the reference uses the same values.
    weight = 1.3
    bias = -0.25
    eps = 1e-5

    # (8, 256):  lane-dense F, small batch.
    # (100, 256): N not a multiple of the row block -> exercises the ragged
    #             last-block masked writeback (no pad / no slice).
    # (2, 32):   tiny non-aligned shape (block last dim equals full array dim).
    cases = [(8, 256), (100, 256), (2, 32)]

    for i, (N, F) in enumerate(cases):
        k = jax.random.fold_in(key, i)
        x = jax.random.normal(k, (N, F), jnp.float32)

        out = jax.block_until_ready(
            instance_norm_fc_forward(x, weight, bias, eps))
        ref = instance_norm_fc_reference(x, weight, bias, eps)

        assert out.shape == (N, F)
        assert jnp.allclose(out, ref, atol=2e-5, rtol=2e-5), (
            f"case {(N, F)}: max err {jnp.max(jnp.abs(out - ref))}")

    print("KERNEL_OK")
</pallas_src>

<mosaic_0001>
module attributes {stable_mosaic.version = 11 : i64} {
  func.func @instance_norm_fc_kernel(%arg0: i32, %arg1: memref<3xf32, #tpu.memory_space<smem>>, %arg2: memref<8x256xf32, #tpu.memory_space<vmem>>, %arg3: memref<8x256xf32, #tpu.memory_space<vmem>>) attributes {dimension_semantics = [#tpu.dimension_semantics<parallel>], iteration_bounds = array<i64: 1>, scalar_prefetch = 0 : i64, scratch_operands = 0 : i64, tpu.core_type = #tpu.core_type<tc>, window_params = [{transform_indices = @transform_0, window_bounds = array<i64: 3>}, {transform_indices = @transform_1, window_bounds = array<i64: 8, 256>}, {transform_indices = @transform_2, window_bounds = array<i64: 8, 256>}]} {
    %c0 = arith.constant 0 : index
    %0 = memref.load %arg1[%c0] : memref<3xf32, #tpu.memory_space<smem>>
    %c1 = arith.constant 1 : index
    %1 = memref.load %arg1[%c1] : memref<3xf32, #tpu.memory_space<smem>>
    %c2 = arith.constant 2 : index
    %2 = memref.load %arg1[%c2] : memref<3xf32, #tpu.memory_space<smem>>
    %c0_0 = arith.constant 0 : index
    %c0_1 = arith.constant 0 : index
    %3 = vector.load %arg2[%c0_0, %c0_1] : memref<8x256xf32, #tpu.memory_space<vmem>>, vector<8x256xf32>
    %cst = arith.constant dense<0.000000e+00> : vector<8xf32>
    %4 = vector.multi_reduction <add>, %3, %cst [1] : vector<8x256xf32> to vector<8xf32>
    %5 = vector.shape_cast %4 : vector<8xf32> to vector<8x1xf32>
    %6 = arith.mulf %3, %3 : vector<8x256xf32>
    %cst_2 = arith.constant dense<0.000000e+00> : vector<8xf32>
    %7 = vector.multi_reduction <add>, %6, %cst_2 [1] : vector<8x256xf32> to vector<8xf32>
    %8 = vector.shape_cast %7 : vector<8xf32> to vector<8x1xf32>
    %cst_3 = arith.constant 3.906250e-03 : f32
    %9 = vector.broadcast %cst_3 : f32 to vector<8x1xf32>
    %10 = arith.mulf %5, %9 : vector<8x1xf32>
    %cst_4 = arith.constant 3.906250e-03 : f32
    %11 = vector.broadcast %cst_4 : f32 to vector<8x1xf32>
    %12 = arith.mulf %8, %11 : vector<8x1xf32>
    %13 = arith.mulf %10, %10 : vector<8x1xf32>
    %14 = arith.subf %12, %13 : vector<8x1xf32>
    %cst_5 = arith.constant 0.000000e+00 : f32
    %15 = vector.broadcast %cst_5 : f32 to vector<8x1xf32>
    %16 = arith.maximumf %14, %15 : vector<8x1xf32>
    %17 = vector.broadcast %2 : f32 to vector<8x1xf32>
    %18 = arith.addf %16, %17 : vector<8x1xf32>
    %19 = math.rsqrt %18 : vector<8x1xf32>
    %20 = vector.broadcast %0 : f32 to vector<8x1xf32>
    %21 = arith.mulf %19, %20 : vector<8x1xf32>
    %22 = arith.mulf %10, %21 : vector<8x1xf32>
    %23 = vector.broadcast %1 : f32 to vector<8x1xf32>
    %24 = arith.subf %23, %22 : vector<8x1xf32>
    %25 = vector.broadcast %21 : vector<8x1xf32> to vector<8x256xf32>
    %26 = arith.mulf %3, %25 : vector<8x256xf32>
    %27 = vector.broadcast %24 : vector<8x1xf32> to vector<8x256xf32>
    %28 = arith.addf %26, %27 : vector<8x256xf32>
    %c0_6 = arith.constant 0 : index
    %c0_7 = arith.constant 0 : index
    %29 = vector.load %arg3[%c0_6, %c0_7] : memref<8x256xf32, #tpu.memory_space<vmem>>, vector<8x256xf32>
    tpu.vector_store %arg3[%c0_6, %c0_7], %28 {strides = array<i32>} : memref<8x256xf32, #tpu.memory_space<vmem>>, vector<8x256xf32>,
    return
  }
  func.func @transform_0(%arg0: i32) -> i32 {
    %c0_i32 = arith.constant 0 : i32
    %c0_i32_0 = arith.constant 0 : i32
    return %c0_i32 : i32
  }
  func.func @transform_1(%arg0: i32) -> (i32, i32) {
    %c0_i32 = arith.constant 0 : i32
    %c0_i32_0 = arith.constant 0 : i32
    return %arg0, %c0_i32 : i32, i32
  }
  func.func @transform_2(%arg0: i32) -> (i32, i32) {
    %c0_i32 = arith.constant 0 : i32
    %c0_i32_0 = arith.constant 0 : i32
    return %arg0, %c0_i32 : i32, i32
  }
}

</mosaic_0001>

<bundles_post_ra>
// kernel: tpu_custom_call.1
= control target key start
LH: loop header
LB: loop body
LE: loop exit
PB: predicated region body
PF: predicated region fallthrough
CT: control target
= control target key end

     0   :  { %7 = vsyncpa [#allocation5], 0  ;;  %s198_s0 = inlined_call_operand.hbm [shape: f32[3], index: 0, kind: input, shape index: {}]   ;;  %s199_s1 = inlined_call_operand.hbm [shape: f32[8,256], index: 1, kind: input, shape index: {}]   ;;  %s200_s2 = inlined_call_operand.hbm [shape: f32[8,256], index: 2, kind: output, shape index: {}]  }
   0x1   :  { %8 = vsyncpa [#allocation3], 0 }
   0x2   :  { %9 = vsyncpa [#allocation4], 0  ;;  %s15_s11 = sshll.u32 %s198_s0, 4  ;;  %s24_s14 = sshll.u32 %s199_s1, 4  ;;  %s16_s11 = int_to_ptr.hbm [resolvable:$true] %s15_s11  ;;  %s25_s14 = int_to_ptr.hbm [resolvable:$true] %s24_s14 }
   0x3   :  { %s171_s15 = smov [#allocation2]   ;;  %s172_s16 = smov [#allocation6]  }
   0x4   :  { %18 = dma.hbm_to_smem %s16_s11, 16, %s171_s15, [#allocation5]  }
   0x5   :  { %s26_s17 = sshll.u32 %s172_s16, 4  ;;  %s27_s17 = int_to_ptr.vmem [resolvable:$true] %s26_s17 }
   0x6   :  { %29 = dma.hbm_to_vmem [thread:$0]  %s25_s14, 256, %s27_s17, [#allocation3]  }
   0x7   :  { %165 = dma.done.wait [#allocation5], 16  }
   0x8   :  { %166 = vsyncadd [#allocation5], 4294967280 }
   0x9   :  { %167 = dma.done.wait [#allocation3], 256  }
   0xa   :  { %168 = vsyncadd [#allocation3], 4294967040 }
   0xb   :  { %38 = sfence }
   0xc   :  { %v42_v0 = vld [vmem:[#allocation6] sm:$0xff]  ;;  %v43_v1 = vld [vmem:[#allocation6 + $0x8] sm:$0xff]  ;;  %s99_s0 = sld [smem:[#allocation2 + $0x2]]  ;;  %s173_s19 = smov [#allocation7]  }
   0xd   :  { %v44_v2 = vadd.f32 %v43_v1, %v42_v0  ;;  %v47_v3 = vmul.f32 %v42_v0, %v42_v0  ;;  %v48_v4 = vmul.f32 %v43_v1, %v43_v1  ;;  %s39_s1 = sld [smem:[#allocation2]]  ;;  %s85_s20 = sshll.u32 %s173_s19, 4  ;;  %s86_s20 = int_to_ptr.vmem [resolvable:$true] %s85_s20 }
   0xe   :  { %s98_s18 = sld [smem:[#allocation2 + $0x1]]  ;;  %s87_s23 = sshll.u32 %s200_s2, 4  ;;  %s88_s23 = int_to_ptr.hbm [resolvable:$true] %s87_s23 }
   0xf   :  { %45 = vadd.xlane.f32.xlu0 %v44_v2  ;;  %v49_v5 = vadd.f32 %v48_v4, %v47_v3 }
  0x12   :  { %v57_v12 = vstv %s99_s0 }
  0x13   :  { %v69_v21 = vstv %s39_s1 }
  0x14   :  { %v72_v24 = vstv %s98_s18 }
  0x17   :  { %50 = vadd.xlane.f32.xlu0 %v49_v5 }
  0x82   :  { %v46_v6 = vpop.xlane.xlu0 %45 }
  0x83   :  { %v52_v7 = vmul.f32 0.00390625, %v46_v6 }
  0x85   :  { %v54_v9 = vmul.f32 %v52_v7, %v52_v7 }
  0x8a   :  { %v51_v8 = vpop.xlane.xlu0 %50 }
  0x8b   :  { %v53_v10 = vmul.f32 0.00390625, %v51_v8 }
  0x8d   :  { %v55_v11 = vsub.f32 %v53_v10, %v54_v9 }
  0x8f   :  { %v56_v13 = vmax.f32 %v55_v11, 0.0 }
  0x91   :  { %v58_v14 = vadd.f32 %v57_v12, %v56_v13 }
  0x93   :  { %103 = vrsqrt.f32 %v58_v14  ;;  %vm65_vm1 = vweird.f32 %v58_v14 }
  0x99   :  { %v104_v15 = vpop.eup %103 }
  0x9a   :  { %v60_v16 = vmul.f32 %v104_v15, %v58_v14  ;;  %vm66_vm0 = vweird.f32 %v104_v15 }
  0x9b   :  { %vm67_vm2 = vmor %vm65_vm1, %vm66_vm0 }
  0x9c   :  { %v61_v17 = vmul.f32 %v104_v15, %v60_v16 }
  0x9e   :  { %v62_v18 = vmul.f32 0.5, %v61_v17 }
  0xa0   :  { %v63_v19 = vsub.f32 1.5, %v62_v18 }
  0xa2   :  { %v64_v20 = vmul.f32 %v104_v15, %v63_v19 }
  0xa4   :  { %v68_v22 = vsel %vm67_vm2, %v104_v15, %v64_v20 }
  0xa5   :  { %v70_v23 = vmul.f32 %v69_v21, %v68_v22 }
  0xa7   :  { %v71_v25 = vmul.f32 %v70_v23, %v52_v7  ;;  %v74_v27 = vmul.f32 %v70_v23, %v42_v0  ;;  %v75_v28 = vmul.f32 %v70_v23, %v43_v1 }
  0xa9   :  { %v73_v26 = vsub.f32 %v72_v24, %v71_v25 }
  0xab   :  { %v76_v29 = vadd.f32 %v74_v27, %v73_v26  ;;  %v77_v30 = vadd.f32 %v75_v28, %v73_v26 }
  0xad   :  { %78 = vst [vmem:[#allocation7] sm:$0xff] %v76_v29 }
  0xae   :  { %79 = vst [vmem:[#allocation7 + $0x8] sm:$0xff] %v77_v30 }
  0xaf   :  { %90 = dma.vmem_to_hbm [thread:$0]  %s86_s20, 256, %s88_s23, [#allocation4]  }
  0xb0   :  { %169 = dma.done.wait [#allocation4], 256  }
  0xb1   :  { %170 = vsyncadd [#allocation4], 4294967040 }
  0xb2   :  { %95 = vsyncpa [#allocation3], 1 }
  0xb3   :  { %96 = vsyncpa [#allocation4], 1 }
  0xb4   :  { %97 = vsyncpa [#allocation5], 1 }

</bundles_post_ra>
